<compile_context>
chip_gen: v6e
topology: v6e:2x2x1
jax: 0.10.0
libtpu: 0.0.40
codegen_flags: <defaults>
</compile_context>

<pallas_src>
import jax
import jax.numpy as jnp
from jax import lax
from jax.experimental import pallas as pl
from jax.experimental.pallas import tpu as pltpu


def _group_kernel(xyzt_ref, center_ref, nb_ref, nborg_ref, dist_ref):
    x_t = xyzt_ref[...]                      # (Bb, 3, N) f32, coords on sublanes
    Bb = x_t.shape[0]
    N = x_t.shape[2]
    G = center_ref.shape[2]
    M = nb_ref.shape[0]

    iota_n = lax.broadcasted_iota(jnp.int32, (Bb, 1, N), 2)   # points on lanes
    iota_g = lax.broadcasted_iota(jnp.int32, (Bb, 1, G), 2)   # centers on lanes

    # ---------------- furthest point sampling (G sequential steps) -----------
    # Matches pointnet2 furthest_point_sample: start at index 0, repeatedly pick
    # the point maximizing its min-distance to the already-selected set.
    def fps_body(i, carry):
        mindist, cur, centers = carry                       # (Bb,1,N), (Bb,1,1), (Bb,3,G)
        onehot = (iota_n == cur).astype(jnp.float32)        # (Bb,1,N) lane-dense
        pt = jnp.sum(x_t * onehot, axis=2, keepdims=True)   # (Bb,3,1) current point
        centers = jnp.where(iota_g == i, pt, centers)       # write column i
        d = jnp.sum((x_t - pt) ** 2, axis=1, keepdims=True)  # (Bb,1,N) 3-sublane reduce
        # This is exactly row i of the center->points kNN distance matrix.
        dist_ref[:, pl.ds(i, 1), :] = d
        mindist = jnp.minimum(mindist, d)
        dmax = jnp.max(mindist, axis=2, keepdims=True)       # (Bb,1,1)
        nxt = jnp.min(jnp.where(mindist == dmax, iota_n, N),
                      axis=2, keepdims=True).astype(jnp.int32)
        return mindist, nxt, centers

    _, _, centers = lax.fori_loop(
        0, G, fps_body,
        (jnp.full((Bb, 1, N), 1e10, jnp.float32),
         jnp.zeros((Bb, 1, 1), jnp.int32),
         jnp.zeros((Bb, 3, G), jnp.float32)))

    center_ref[...] = centers                                # (Bb,3,G) lane-dense store

    # ---------------- kNN: M nearest points per center (ascending) -----------
    iota_gn = lax.broadcasted_iota(jnp.int32, (Bb, G, N), 2)

    def knn_body(m, dist):                                   # dist: (Bb,G,N)
        dmin = jnp.min(dist, axis=2, keepdims=True)          # (Bb,G,1)
        sel = jnp.min(jnp.where(dist == dmin, iota_gn, N),
                      axis=2, keepdims=True)                 # (Bb,G,1) int32
        onehot = (iota_gn == sel).astype(jnp.float32)        # (Bb,G,N)
        # One-hot gather on the MXU; contraction over the lane axis (flash-attn
        # 'bqd,bkd->bqk' pattern), lane-dense (Bb,3,G) result.
        nb = jnp.einsum('bcn,bgn->bcg', x_t, onehot,
                        preferred_element_type=jnp.float32)
        nborg_ref[m] = nb                                    # dense (Bb,3,G) store
        nb_ref[m] = nb - centers                             # centered neighborhood
        return jnp.where(iota_gn == sel, jnp.float32(1e30), dist)  # mask selected

    lax.fori_loop(0, M, knn_body, dist_ref[...])


def group_forward(xyz, num_group, group_size, batch_block=8):
    """xyz: (B, N, 3) float32 -> (neighborhood, center, neighborhood_org)."""
    B, N, _ = xyz.shape
    G, M = int(num_group), int(group_size)
    xyz = xyz.astype(jnp.float32)

    Bb = min(int(batch_block), B)            # batches per grid step (amortize overhead)
    B_pad = ((B + Bb - 1) // Bb) * Bb

    xyz_t = jnp.transpose(xyz, (0, 2, 1))    # (B, 3, N) coord-major, lane-dense in N
    if B_pad != B:
        xyz_t = jnp.pad(xyz_t, ((0, B_pad - B), (0, 0), (0, 0)))

    # Kernel-side outputs are lane-dense (last dim = G); the PyTorch layouts are
    # recovered with cheap transposes in the wrapper.
    out_shapes = (
        jax.ShapeDtypeStruct((B_pad, 3, G), jnp.float32),      # center (coord-major)
        jax.ShapeDtypeStruct((M, B_pad, 3, G), jnp.float32),   # neighborhood
        jax.ShapeDtypeStruct((M, B_pad, 3, G), jnp.float32),   # neighborhood_org
    )
    grid_spec = pltpu.PrefetchScalarGridSpec(
        num_scalar_prefetch=0,
        grid=(B_pad // Bb,),
        in_specs=[pl.BlockSpec((Bb, 3, N), lambda b: (b, 0, 0))],
        out_specs=[
            pl.BlockSpec((Bb, 3, G), lambda b: (b, 0, 0)),
            pl.BlockSpec((M, Bb, 3, G), lambda b: (0, b, 0, 0)),
            pl.BlockSpec((M, Bb, 3, G), lambda b: (0, b, 0, 0)),
        ],
        # kNN distance matrix built for free during FPS (no stacked one-hot slab,
        # so VMEM stays bounded even at full Point-MAE sizes; cf. v7x 64 MiB).
        scratch_shapes=[pltpu.VMEM((Bb, G, N), jnp.float32)],
    )
    center_cg, nb_t, nborg_t = pl.pallas_call(
        _group_kernel,
        out_shape=out_shapes,
        grid_spec=grid_spec,
        compiler_params=pltpu.CompilerParams(
            dimension_semantics=("parallel",)),   # batch axis shards across v7x TCs
    )(xyz_t)

    center = jnp.transpose(center_cg, (0, 2, 1))[:B]             # (B, G, 3)
    neighborhood = jnp.transpose(nb_t, (1, 3, 0, 2))[:B]         # (B, G, M, 3)
    neighborhood_org = jnp.transpose(nborg_t, (1, 3, 0, 2))[:B]  # (B, G, M, 3)
    return neighborhood, center, neighborhood_org


def _group_ref(xyz, G, M):
    """Pure-JAX reference (FPS + kNN) for correctness checking."""
    B, N, _ = xyz.shape

    def fps_one(pts):
        def body(i, carry):
            mind, cur, cent = carry
            cpt = pts[cur]                                   # (3,)
            cent = cent.at[i].set(cpt)
            d = jnp.sum((pts - cpt[None, :]) ** 2, axis=-1)  # (N,)
            mind = jnp.minimum(mind, d)
            nxt = jnp.argmax(mind).astype(jnp.int32)
            return mind, nxt, cent

        _, _, cent = lax.fori_loop(
            0, G, body,
            (jnp.full((N,), 1e10, jnp.float32), jnp.int32(0),
             jnp.zeros((G, 3), jnp.float32)))
        return cent

    centers = jax.vmap(fps_one)(xyz)                                       # (B,G,3)
    d2 = jnp.sum((centers[:, :, None, :] - xyz[:, None, :, :]) ** 2, -1)   # (B,G,N)
    idx = jnp.argsort(d2, axis=-1)[:, :, :M]                               # (B,G,M)
    nborg = xyz[jnp.arange(B)[:, None, None], idx]                         # (B,G,M,3)
    nb = nborg - centers[:, :, None, :]
    return nb, centers, nborg


if __name__ == "__main__":
    key = jax.random.PRNGKey(0)
    B, N = 2, 64
    num_group, group_size = 8, 8

    xyz = jax.random.normal(key, (B, N, 3), dtype=jnp.float32)

    nb, center, nb_org = jax.block_until_ready(
        group_forward(xyz, num_group, group_size))

    assert nb.shape == (B, num_group, group_size, 3)
    assert center.shape == (B, num_group, 3)
    assert nb_org.shape == (B, num_group, group_size, 3)

    # FPS starts from point 0 -> first center is xyz[:, 0].
    assert jnp.allclose(center[:, 0, :], xyz[:, 0, :], atol=1e-5)
    # The nearest neighbor of each center is the center itself.
    assert jnp.allclose(nb_org[:, :, 0, :], center, atol=1e-4)
    # neighborhood == neighborhood_org - center (broadcast over group dim).
    assert jnp.allclose(nb, nb_org - center[:, :, None, :], atol=1e-5)

    # Pure-JAX reference comparison.
    nb_r, center_r, nborg_r = _group_ref(xyz, num_group, group_size)
    assert jnp.allclose(center, center_r, atol=1e-5)
    # Compare neighbor distances (robust to tie-ordering on near-equal points).
    d_k = jnp.sum((nb_org - center[:, :, None, :]) ** 2, axis=-1)
    d_r = jnp.sum((nborg_r - center_r[:, :, None, :]) ** 2, axis=-1)
    assert jnp.allclose(d_k, d_r, atol=1e-4)

    print("KERNEL_OK")
</pallas_src>

<mosaic_0001>
module attributes {stable_mosaic.version = 11 : i64} {
  func.func @_group_kernel(%arg0: i32, %arg1: memref<2x3x64xf32, #tpu.memory_space<vmem>>, %arg2: memref<2x3x8xf32, #tpu.memory_space<vmem>>, %arg3: memref<8x2x3x8xf32, #tpu.memory_space<vmem>>, %arg4: memref<8x2x3x8xf32, #tpu.memory_space<vmem>>, %arg5: memref<2x8x64xf32, #tpu.memory_space<vmem>>) attributes {dimension_semantics = [#tpu.dimension_semantics<parallel>], iteration_bounds = array<i64: 1>, scalar_prefetch = 0 : i64, scratch_operands = 1 : i64, tpu.core_type = #tpu.core_type<tc>, window_params = [{transform_indices = @transform_0, window_bounds = array<i64: 2, 3, 64>}, {transform_indices = @transform_1, window_bounds = array<i64: 2, 3, 8>}, {transform_indices = @transform_2, window_bounds = array<i64: 8, 2, 3, 8>}, {transform_indices = @transform_3, window_bounds = array<i64: 8, 2, 3, 8>}]} {
    %c0 = arith.constant 0 : index
    %c0_0 = arith.constant 0 : index
    %c0_1 = arith.constant 0 : index
    %0 = vector.load %arg1[%c0, %c0_0, %c0_1] : memref<2x3x64xf32, #tpu.memory_space<vmem>>, vector<2x3x64xf32>
    %1 = tpu.iota {dimensions = array<i32: 2>} : vector<2x1x64xi32>
    %2 = tpu.iota {dimensions = array<i32: 2>} : vector<2x1x8xi32>
    %cst = arith.constant 1.000000e+10 : f32
    %3 = vector.broadcast %cst : f32 to vector<2x1x64xf32>
    %c0_i32 = arith.constant 0 : i32
    %4 = vector.broadcast %c0_i32 : i32 to vector<2x1x1xi32>
    %cst_2 = arith.constant 0.000000e+00 : f32
    %5 = vector.broadcast %cst_2 : f32 to vector<2x3x8xf32>
    %c0_i32_3 = arith.constant 0 : i32
    %c8_i32 = arith.constant 8 : i32
    %6 = arith.addi %c0_i32_3, %c8_i32 : i32
    %c1_i32 = arith.constant 1 : i32
    %7:3 = scf.for %arg6 = %c0_i32_3 to %6 step %c1_i32 iter_args(%arg7 = %3, %arg8 = %4, %arg9 = %5) -> (vector<2x1x64xf32>, vector<2x1x1xi32>, vector<2x3x8xf32>)  : i32 {
      %13 = vector.broadcast %arg8 : vector<2x1x1xi32> to vector<2x1x64xi32>
      %14 = arith.cmpi eq, %1, %13 : vector<2x1x64xi32>
      %15 = arith.extui %14 : vector<2x1x64xi1> to vector<2x1x64xi32>
      %16 = arith.sitofp %15 : vector<2x1x64xi32> to vector<2x1x64xf32>
      %17 = vector.broadcast %16 : vector<2x1x64xf32> to vector<2x3x64xf32>
      %18 = arith.mulf %0, %17 : vector<2x3x64xf32>
      %cst_15 = arith.constant dense<0.000000e+00> : vector<2x3xf32>
      %19 = vector.multi_reduction <add>, %18, %cst_15 [2] : vector<2x3x64xf32> to vector<2x3xf32>
      %20 = vector.shape_cast %19 : vector<2x3xf32> to vector<2x3x1xf32>
      %21 = vector.broadcast %arg6 : i32 to vector<2x1x8xi32>
      %22 = arith.cmpi eq, %2, %21 : vector<2x1x8xi32>
      %23 = vector.shape_cast %22 : vector<2x1x8xi1> to vector<2x1x8xi1>
      %24 = vector.broadcast %23 : vector<2x1x8xi1> to vector<2x3x8xi1>
      %25 = vector.shape_cast %20 : vector<2x3x1xf32> to vector<2x3x1xf32>
      %26 = vector.broadcast %25 : vector<2x3x1xf32> to vector<2x3x8xf32>
      %27 = arith.select %24, %26, %arg9 : vector<2x3x8xi1>, vector<2x3x8xf32>
      %28 = vector.broadcast %20 : vector<2x3x1xf32> to vector<2x3x64xf32>
      %29 = arith.subf %0, %28 : vector<2x3x64xf32>
      %30 = arith.mulf %29, %29 : vector<2x3x64xf32>
      %cst_16 = arith.constant dense<0.000000e+00> : vector<2x64xf32>
      %31 = vector.multi_reduction <add>, %30, %cst_16 [1] : vector<2x3x64xf32> to vector<2x64xf32>
      %32 = vector.shape_cast %31 : vector<2x64xf32> to vector<2x1x64xf32>
      %c0_17 = arith.constant 0 : index
      %33 = arith.index_cast %arg6 : i32 to index
      %c0_18 = arith.constant 0 : index
      %34 = vector.load %arg5[%c0_17, %33, %c0_18] : memref<2x8x64xf32, #tpu.memory_space<vmem>>, vector<2x1x64xf32>
      tpu.vector_store %arg5[%c0_17, %33, %c0_18], %32 {strides = array<i32>} : memref<2x8x64xf32, #tpu.memory_space<vmem>>, vector<2x1x64xf32>,
      %35 = arith.minimumf %arg7, %32 : vector<2x1x64xf32>
      %cst_19 = arith.constant dense<0xFF800000> : vector<2x1xf32>
      %36 = vector.multi_reduction <maximumf>, %35, %cst_19 [2] : vector<2x1x64xf32> to vector<2x1xf32>
      %37 = vector.shape_cast %36 : vector<2x1xf32> to vector<2x1x1xf32>
      %38 = vector.broadcast %37 : vector<2x1x1xf32> to vector<2x1x64xf32>
      %39 = arith.cmpf oeq, %35, %38 : vector<2x1x64xf32>
      %c64_i32 = arith.constant 64 : i32
      %40 = vector.broadcast %c64_i32 : i32 to vector<2x1x64xi32>
      %41 = arith.select %39, %1, %40 : vector<2x1x64xi1>, vector<2x1x64xi32>
      %cst_20 = arith.constant dense<2147483647> : vector<2x1xi32>
      %42 = vector.multi_reduction <minsi>, %41, %cst_20 [2] : vector<2x1x64xi32> to vector<2x1xi32>
      %43 = vector.shape_cast %42 : vector<2x1xi32> to vector<2x1x1xi32>
      scf.yield %35, %43, %27 : vector<2x1x64xf32>, vector<2x1x1xi32>, vector<2x3x8xf32>
    }
    %c8_i32_4 = arith.constant 8 : i32
    %c0_5 = arith.constant 0 : index
    %c0_6 = arith.constant 0 : index
    %c0_7 = arith.constant 0 : index
    %8 = vector.load %arg2[%c0_5, %c0_6, %c0_7] : memref<2x3x8xf32, #tpu.memory_space<vmem>>, vector<2x3x8xf32>
    tpu.vector_store %arg2[%c0_5, %c0_6, %c0_7], %7#2 {strides = array<i32>} : memref<2x3x8xf32, #tpu.memory_space<vmem>>, vector<2x3x8xf32>,
    %9 = tpu.iota {dimensions = array<i32: 2>} : vector<2x8x64xi32>
    %c0_8 = arith.constant 0 : index
    %c0_9 = arith.constant 0 : index
    %c0_10 = arith.constant 0 : index
    %10 = vector.load %arg5[%c0_8, %c0_9, %c0_10] : memref<2x8x64xf32, #tpu.memory_space<vmem>>, vector<2x8x64xf32>
    %c0_i32_11 = arith.constant 0 : i32
    %c8_i32_12 = arith.constant 8 : i32
    %11 = arith.addi %c0_i32_11, %c8_i32_12 : i32
    %c1_i32_13 = arith.constant 1 : i32
    %12 = scf.for %arg6 = %c0_i32_11 to %11 step %c1_i32_13 iter_args(%arg7 = %10) -> (vector<2x8x64xf32>)  : i32 {
      %cst_15 = arith.constant dense<0x7F800000> : vector<2x8xf32>
      %13 = vector.multi_reduction <minimumf>, %arg7, %cst_15 [2] : vector<2x8x64xf32> to vector<2x8xf32>
      %14 = vector.shape_cast %13 : vector<2x8xf32> to vector<2x8x1xf32>
      %15 = vector.broadcast %14 : vector<2x8x1xf32> to vector<2x8x64xf32>
      %16 = arith.cmpf oeq, %arg7, %15 : vector<2x8x64xf32>
      %c64_i32 = arith.constant 64 : i32
      %17 = vector.broadcast %c64_i32 : i32 to vector<2x8x64xi32>
      %18 = arith.select %16, %9, %17 : vector<2x8x64xi1>, vector<2x8x64xi32>
      %cst_16 = arith.constant dense<2147483647> : vector<2x8xi32>
      %19 = vector.multi_reduction <minsi>, %18, %cst_16 [2] : vector<2x8x64xi32> to vector<2x8xi32>
      %20 = vector.shape_cast %19 : vector<2x8xi32> to vector<2x8x1xi32>
      %21 = vector.broadcast %20 : vector<2x8x1xi32> to vector<2x8x64xi32>
      %22 = arith.cmpi eq, %9, %21 : vector<2x8x64xi32>
      %23 = arith.extui %22 : vector<2x8x64xi1> to vector<2x8x64xi32>
      %24 = arith.sitofp %23 : vector<2x8x64xi32> to vector<2x8x64xf32>
      "tpu.trace_start"() <{level = 10 : i32, message = "bcn,bgn->bcg"}> : () -> ()
      %cst_17 = arith.constant dense<0.000000e+00> : vector<2x3x8xf32>
      %25 = tpu.matmul %0, %24, %cst_17 {dimension_numbers = #tpu.dot_dimension_numbers<[2], [2], [1], [1], [0, 0, 0, 1, 1, 1], [0], [0]>} : vector<2x3x64xf32>, vector<2x8x64xf32>, vector<2x3x8xf32> -> vector<2x3x8xf32>
      "tpu.trace_stop"() : () -> ()
      %26 = arith.index_cast %arg6 : i32 to index
      %c0_18 = arith.constant 0 : index
      %c0_19 = arith.constant 0 : index
      %c0_20 = arith.constant 0 : index
      %27 = vector.load %arg4[%26, %c0_18, %c0_19, %c0_20] : memref<8x2x3x8xf32, #tpu.memory_space<vmem>>, vector<1x2x3x8xf32>
      %28 = vector.shape_cast %27 : vector<1x2x3x8xf32> to vector<2x3x8xf32>
      %29 = vector.shape_cast %25 : vector<2x3x8xf32> to vector<1x2x3x8xf32>
      tpu.vector_store %arg4[%26, %c0_18, %c0_19, %c0_20], %29 {strides = array<i32>} : memref<8x2x3x8xf32, #tpu.memory_space<vmem>>, vector<1x2x3x8xf32>,
      %30 = arith.subf %25, %7#2 : vector<2x3x8xf32>
      %31 = arith.index_cast %arg6 : i32 to index
      %c0_21 = arith.constant 0 : index
      %c0_22 = arith.constant 0 : index
      %c0_23 = arith.constant 0 : index
      %32 = vector.load %arg3[%31, %c0_21, %c0_22, %c0_23] : memref<8x2x3x8xf32, #tpu.memory_space<vmem>>, vector<1x2x3x8xf32>
      %33 = vector.shape_cast %32 : vector<1x2x3x8xf32> to vector<2x3x8xf32>
      %34 = vector.shape_cast %30 : vector<2x3x8xf32> to vector<1x2x3x8xf32>
      tpu.vector_store %arg3[%31, %c0_21, %c0_22, %c0_23], %34 {strides = array<i32>} : memref<8x2x3x8xf32, #tpu.memory_space<vmem>>, vector<1x2x3x8xf32>,
      %35 = vector.broadcast %20 : vector<2x8x1xi32> to vector<2x8x64xi32>
      %36 = arith.cmpi eq, %9, %35 : vector<2x8x64xi32>
      %cst_24 = arith.constant 1.000000e+30 : f32
      %37 = vector.broadcast %cst_24 : f32 to vector<2x8x64xf32>
      %38 = arith.select %36, %37, %arg7 : vector<2x8x64xi1>, vector<2x8x64xf32>
      scf.yield %38 : vector<2x8x64xf32>
    }
    %c8_i32_14 = arith.constant 8 : i32
    return
  }
  func.func @transform_0(%arg0: i32) -> (i32, i32, i32) {
    %c0_i32 = arith.constant 0 : i32
    %c0_i32_0 = arith.constant 0 : i32
    %c0_i32_1 = arith.constant 0 : i32
    return %arg0, %c0_i32, %c0_i32_0 : i32, i32, i32
  }
  func.func @transform_1(%arg0: i32) -> (i32, i32, i32) {
    %c0_i32 = arith.constant 0 : i32
    %c0_i32_0 = arith.constant 0 : i32
    %c0_i32_1 = arith.constant 0 : i32
    return %arg0, %c0_i32, %c0_i32_0 : i32, i32, i32
  }
  func.func @transform_2(%arg0: i32) -> (i32, i32, i32, i32) {
    %c0_i32 = arith.constant 0 : i32
    %c0_i32_0 = arith.constant 0 : i32
    %c0_i32_1 = arith.constant 0 : i32
    %c0_i32_2 = arith.constant 0 : i32
    return %c0_i32, %arg0, %c0_i32_0, %c0_i32_1 : i32, i32, i32, i32
  }
  func.func @transform_3(%arg0: i32) -> (i32, i32, i32, i32) {
    %c0_i32 = arith.constant 0 : i32
    %c0_i32_0 = arith.constant 0 : i32
    %c0_i32_1 = arith.constant 0 : i32
    %c0_i32_2 = arith.constant 0 : i32
    return %c0_i32, %arg0, %c0_i32_0, %c0_i32_1 : i32, i32, i32, i32
  }
}

</mosaic_0001>

<bundles_post_ra>
// kernel: tpu_custom_call.1
= control target key start
LH: loop header
LB: loop body
LE: loop exit
PB: predicated region body
PF: predicated region fallthrough
CT: control target
= control target key end

     0   :  { %v13_v0 = vlaneseq  ;;  %v608_v4 = vmov 0.0   ;;  %v610_v5 = vmov 0.0   ;;  %v612_v6 = vmov 0   ;;  %s620_s16 = smov 0   ;;  %s726_s0 = inlined_call_operand.vmem [shape: f32[2,3,64], index: 0, kind: input, shape index: {}]   ;;  %s727_s1 = inlined_call_operand.vmem [shape: f32[2,3,8], index: 1, kind: output, shape index: {0}]   ;;  %s728_s2 = inlined_call_operand.vmem [shape: f32[8,2,3,8], index: 2, kind: output, shape index: {1}]   ;;  %s729_s3 = inlined_call_operand.vmem [shape: f32[8,2,3,8], index: 3, kind: output, shape index: {2}]  }
   0x1   :  { %v599_v1 = vld [vmem:[%s726_s0] sm:$0x7]  ;;  %v604_v2 = vld [vmem:[%s726_s0 + $0x4] sm:$0x7]  ;;  %v614_v7 = vmov 0  }
   0x2   :  { %v606_v3 = vand.u32 127, %v13_v0  ;;  %v616_v8 = vmov 1e+10   ;;  %v618_v9 = vmov 1e+10  }
   0x3 LB: > { %v573_v10 = vmov 0.0   ;;  %vm35_vm2 = vcmask 518144   ;;  %v42_v17 = vstv %s559_s16  ;;  %vm67_vm4 = vcmask 516096   ;;  %s66_s0 = scalar_lea.vmem [#allocation2], %s559_s16  ;;  %s20_s16 = sadd.s32 1, %s559_s16   ;;  %s559_s16 = sphi %s620_s16, %s20_s16   ;;  %v555_v9 = vphi %v618_v9, %v70_v9   ;;  %v551_v8 = vphi %v616_v8, %v71_v8   ;;  %v547_v7 = vphi %v614_v7, %v97_v7   ;;  %v543_v6 = vphi %v612_v6, %v112_v6   ;;  %v539_v5 = vphi %v610_v5, %v733_v5   ;;  %v535_v4 = vphi %v608_v4, %v732_v4  }
   0x4   : > { %vm27_vm0 = vcmp.eq.s32.totalorder %v606_v3, %v547_v7  ;;  %vm28_vm1 = vcmp.eq.s32.totalorder %v606_v3, %v543_v6  ;;  %vm43_vm3 = vcmp.eq.s32.totalorder %v606_v3, %v42_v17  ;;  %vm72_vm5 = vcmask 523264   ;;  %p17_p0 = scmp.ge.s32.totalorder %s20_s16, 8  }
   0x5   : > { %v387_v11 = vsel %vm27_vm0, 1.0, %v573_v10  ;;  %v388_v12 = vsel %vm28_vm1, 1.0, %v573_v10  ;;  %vm113_vm10 = vcmask (%p17_p0), 59392   ;;  %s685_s21 = smov (%p17_p0), 0  }
   0x6   : > { %v33_v13 = vmul.f32 %v387_v11, %v599_v1  ;;  %v34_v14 = vmul.f32 %v388_v12, %v604_v2 }
   0x8   : > { %v36_v15 = vsel %vm35_vm2, %v33_v13, 0.0  ;;  %v39_v16 = vsel %vm35_vm2, %v34_v14, 0.0 }
   0x9   : > { %37 = vadd.xlane.f32.xlu0 %v36_v15 }
   0xd   : > { %40 = vadd.xlane.f32.xlu0 %v39_v16 }
  0x92   : > { %v38_v18 = vpop.xlane.xlu0 %37 }
  0x93   : > { %v639_v5 = vsel %vm43_vm3, %v38_v18, %v539_v5   ;;  %v48_v20 = vsub.f32 %v599_v1, %v38_v18 }
  0x94   : > { %v730_v19 = vmov %v639_v5 }
  0x95   : > { %v50_v21 = vmul.f32 %v48_v20, %v48_v20  ;;  %114 = vst.msk [vmem:[%s727_s1] sm:$0x7] (%p17_p0), %vm113_vm10, %v730_v19 }
  0x96   : > { %v41_v22 = vpop.xlane.xlu0 %40 }
  0x97   : > { %v52_v23 = vsel %vm35_vm2, %v50_v21, 0.0  ;;  %v643_v4 = vsel %vm43_vm3, %v41_v22, %v535_v4   ;;  %v49_v25 = vsub.f32 %v604_v2, %v41_v22 }
  0x98   : > { %v731_v24 = vmov %v643_v4  ;;  %v53_v26 = vrot.slane %v52_v23, 4 }
  0x99   : > { %v51_v27 = vmul.f32 %v49_v25, %v49_v25  ;;  %115 = vst.msk [vmem:[%s727_s1 + $0x4] sm:$0x7] (%p17_p0), %vm113_vm10, %v731_v24 }
  0x9a   : > { %v54_v28 = vadd.f32 %v53_v26, %v52_v23 }
  0x9b   : > { %v59_v29 = vsel %vm35_vm2, %v51_v27, 0.0 }
  0x9c   : > { %v55_v30 = vrot.slane %v54_v28, 2  ;;  %v60_v31 = vrot.slane %v59_v29, 4 }
  0x9e   : > { %v61_v32 = vadd.f32 %v60_v31, %v59_v29  ;;  %v56_v33 = vadd.f32 %v55_v30, %v54_v28 }
  0xa0   : > { %v62_v34 = vrot.slane %v61_v32, 2  ;;  %v57_v35 = vrot.slane %v56_v33, 1 }
  0xa2   : > { %v58_v36 = vadd.f32 %v57_v35, %v56_v33  ;;  %v63_v37 = vadd.f32 %v62_v34, %v61_v32 }
  0xa4   : > { %v70_v9 = vmin.f32 %v555_v9, %v58_v36   ;;  %68 = vst.msk [vmem:[%s66_s0] sm:$0x1] %vm67_vm4, %v58_v36  ;;  %v64_v38 = vrot.slane %v63_v37, 1 }
  0xa6   : > { %v73_v39 = vsel %vm72_vm5, %v70_v9, -inf  ;;  %v65_v40 = vadd.f32 %v64_v38, %v63_v37 }
  0xa7   : > { %74 = vmax.xlane.f32.xlu1 %v73_v39 }
  0xa8   : > { %v71_v8 = vmin.f32 %v551_v8, %v65_v40   ;;  %69 = vst.msk [vmem:[%s66_s0 + $0x8] sm:$0x1] %vm67_vm4, %v65_v40 }
  0xaa   : > { %v76_v41 = vsel %vm72_vm5, %v71_v8, -inf }
  0xab   : > { %77 = vmax.xlane.f32.xlu1 %v76_v41 }
  0xaf   :  { %v116_v10 = vld [vmem:[#allocation2] sm:$0xff] (%p17_p0)   ;;  %v117_v11 = vld [vmem:[#allocation2 + $0x8] sm:$0xff] (%p17_p0)  }
 0x130   : > { %v75_v42 = vpop.xlane.xlu1 %74 }
 0x131   : > { %vm79_vm6 = vcmp.eq.f32.partialorder %v70_v9, %v75_v42 }
 0x132   : > { %v81_v43 = vsel %vm79_vm6, %v606_v3, 64 }
 0x133   : > { %v83_v44 = vsel %vm72_vm5, %v81_v43, 2147483647 }
 0x134   : > { %v78_v45 = vpop.xlane.xlu1 %77  ;;  %v85_v46 = vshra.s32 %v83_v44, 16  ;;  %v84_v52 = vand.u32 65535, %v83_v44 }
 0x135   : > { %vm80_vm7 = vcmp.eq.f32.partialorder %v71_v8, %v78_v45 }
 0x136   : > { %v82_v47 = vsel %vm80_vm7, %v606_v3, 64  ;;  %v87_v48 = vcvt.s32.f32 %v85_v46  ;;  %v86_v55 = vcvt.s32.f32 %v84_v52 }
 0x137   : > { %v98_v49 = vsel %vm72_vm5, %v82_v47, 2147483647 }
 0x138   : > { %88 = vmin.xlane.f32.xlu0 %v87_v48  ;;  %v100_v50 = vshra.s32 %v98_v49, 16  ;;  %v99_v53 = vand.u32 65535, %v98_v49 }
 0x13a   : > { %v102_v51 = vcvt.s32.f32 %v100_v50  ;;  %v101_v58 = vcvt.s32.f32 %v99_v53 }
 0x13c   : > { %103 = vmin.xlane.f32.xlu1 %v102_v51 }
 0x1c1   : > { %v89_v54 = vpop.xlane.xlu0 %88 }
 0x1c2   : > { %vm90_vm8 = vcmp.eq.f32.partialorder %v87_v48, %v89_v54  ;;  %v95_v60 = vcvt.f32.s32 %v89_v54 }
 0x1c3   : > { %v91_v56 = vsel %vm90_vm8, %v86_v55, inf }
 0x1c4   : > { %92 = vmin.xlane.f32.xlu0 %v91_v56  ;;  %v96_v62 = vshll.u32 %v95_v60, 16 }
 0x1c5   : > { %v104_v57 = vpop.xlane.xlu1 %103 }
 0x1c6   : > { %vm105_vm9 = vcmp.eq.f32.partialorder %v102_v51, %v104_v57  ;;  %v110_v63 = vcvt.f32.s32 %v104_v57 }
 0x1c7   : > { %v106_v59 = vsel %vm105_vm9, %v101_v58, inf }
 0x1c8   : > { %107 = vmin.xlane.f32.xlu1 %v106_v59  ;;  %v111_v5 = vshll.u32 %v110_v63, 16 }
 0x24d   : > { %v93_v61 = vpop.xlane.xlu0 %92 }
 0x24e   : > { %v94_v0 = vcvt.f32.s32 %v93_v61 }
 0x250   : > { %v97_v7 = vadd.s32 %v96_v62, %v94_v0   ;;  %19 = sbr.rel (!%p17_p0) target bundleno = 3 (0x3), region = 57 }
 0x251   : > { %v108_v4 = vpop.xlane.xlu1 %107 }
 0x252   : > { %v109_v6 = vcvt.f32.s32 %v108_v4  ;;  %v732_v4 = vmov %v731_v24 }
 0x254   : > { %v112_v6 = vadd.s32 %v111_v5, %v109_v6   ;;  %v733_v5 = vmov %v730_v19 }
 0x255 LB: > { %v127_v7 = vsel %vm72_vm5, %v567_v10, inf  ;;  %v130_v8 = vsel %vm72_vm5, %v563_v11, inf  ;;  %v574_v31 = vmov 0.0   ;;  %vm575_vm15 = vmmov 0   ;;  %s395_s1 = sshll.u32 %s571_s21, 3  ;;  %s123_s21 = sadd.s32 1, %s571_s21   ;;  %s571_s21 = sphi %s685_s21, %s123_s21   ;;  %v567_v10 = vphi %v116_v10, %v334_v10   ;;  %v563_v11 = vphi %v117_v11, %v335_v11  }
 0x256   : > { %128 = vmin.xlane.f32.xlu0 %v127_v7  ;;  %400 = vmatprep.subr.mxu0 %v574_v31  ;;  %s326_s24 = scalar_lea.vmem %s729_s3, %s395_s1  ;;  %s331_s27 = scalar_lea.vmem %s728_s2, %s395_s1 }
 0x257   : > { %405 = vmatprep.subr.mxu1 %v574_v31  ;;  %402 = vmatprep.mubr.msk.f32.mxu0 %vm575_vm15, %v574_v31  ;;  %p120_p1 = scmp.ge.s32.totalorder %s123_s21, 8  }
 0x258   : > { %407 = vmatprep.mubr.msk.f32.mxu1 %vm575_vm15, %v574_v31 }
 0x25a   : > { %131 = vmin.xlane.f32.xlu0 %v130_v8 }
 0x2df   : > { %v129_v9 = vpop.xlane.xlu0 %128 }
 0x2e0   : > { %vm133_vm11 = vcmp.eq.f32.partialorder %v567_v10, %v129_v9 }
 0x2e1   : > { %v135_v12 = vsel %vm133_vm11, %v606_v3, 64 }
 0x2e2   : > { %v137_v13 = vsel %vm72_vm5, %v135_v12, 2147483647 }
 0x2e3   : > { %v132_v14 = vpop.xlane.xlu0 %131  ;;  %v139_v15 = vshra.s32 %v137_v13, 16  ;;  %v138_v22 = vand.u32 65535, %v137_v13 }
 0x2e4   : > { %vm134_vm12 = vcmp.eq.f32.partialorder %v563_v11, %v132_v14 }
 0x2e5   : > { %v136_v16 = vsel %vm134_vm12, %v606_v3, 64  ;;  %v141_v17 = vcvt.s32.f32 %v139_v15  ;;  %v140_v26 = vcvt.s32.f32 %v138_v22 }
 0x2e6   : > { %v152_v18 = vsel %vm72_vm5, %v136_v16, 2147483647 }
 0x2e7   : > { %142 = vmin.xlane.f32.xlu1 %v141_v17  ;;  %v154_v20 = vshra.s32 %v152_v18, 16  ;;  %v153_v23 = vand.u32 65535, %v152_v18 }
 0x2e9   : > { %v156_v21 = vcvt.s32.f32 %v154_v20  ;;  %v155_v29 = vcvt.s32.f32 %v153_v23 }
 0x2eb   : > { %157 = vmin.xlane.f32.xlu1 %v156_v21 }
 0x370   : > { %v143_v25 = vpop.xlane.xlu1 %142 }
 0x371   : > { %vm144_vm13 = vcmp.eq.f32.partialorder %v141_v17, %v143_v25  ;;  %v149_v32 = vcvt.f32.s32 %v143_v25 }
 0x372   : > { %v145_v27 = vsel %vm144_vm13, %v140_v26, inf }
 0x373   : > { %146 = vmin.xlane.f32.xlu0 %v145_v27  ;;  %v150_v34 = vshll.u32 %v149_v32, 16 }
 0x374   : > { %v158_v28 = vpop.xlane.xlu1 %157 }
 0x375   : > { %vm159_vm14 = vcmp.eq.f32.partialorder %v156_v21, %v158_v28  ;;  %v164_v35 = vcvt.f32.s32 %v158_v28 }
 0x376   : > { %v160_v30 = vsel %vm159_vm14, %v155_v29, inf }
 0x377   : > { %161 = vmin.xlane.f32.xlu1 %v160_v30  ;;  %v165_v39 = vshll.u32 %v164_v35, 16 }
 0x3fc   : > { %v147_v33 = vpop.xlane.xlu0 %146 }
 0x3fd   : > { %v148_v36 = vcvt.f32.s32 %v147_v33 }
 0x3ff   : > { %v151_v37 = vadd.s32 %v150_v34, %v148_v36 }
 0x400   : > { %v162_v38 = vpop.xlane.xlu1 %161 }
 0x401   : > { %v163_v40 = vcvt.f32.s32 %v162_v38  ;;  %vm167_vm0 = vcmp.eq.s32.totalorder %v606_v3, %v151_v37 }
 0x402   : > { %v389_v41 = vsel %vm167_vm0, 1.0, %v574_v31  ;;  %v334_v10 = vsel %vm167_vm0, 1e+30, %v567_v10  }
 0x403   : > { %v166_v42 = vadd.s32 %v165_v39, %v163_v40  ;;  %401 = vmatpush3.xpose.msk.msra.mxu0 %vm72_vm5, %v389_v41 }
 0x405   : > { %vm168_vm1 = vcmp.eq.s32.totalorder %v606_v3, %v166_v42 }
 0x406   : > { %v390_v43 = vsel %vm168_vm1, 1.0, %v574_v31  ;;  %v335_v11 = vsel %vm168_vm1, 1e+30, %v563_v11   ;;  %403 = vmatmul.mubr.msk.f32.vlgmr.msra.gmra.mxu0 %vm72_vm5, %v599_v1 }
 0x407   : > { %406 = vmatpush3.xpose.msk.msra.mxu1 %vm72_vm5, %v390_v43 }
 0x40a   : > { %408 = vmatmul.mubr.msk.f32.vlgmr.msra.gmra.mxu1 %vm72_vm5, %v604_v2 }
 0x4c6   : > { %v245_v44 = vpop.f32.mrf.mxu0 }
 0x4c7   : > { %327 = vst.msk [vmem:[%s326_s24] sm:$0x7] %vm113_vm10, %v245_v44  ;;  %v329_v45 = vsub.f32 %v245_v44, %v730_v19 }
 0x4c8   : > { %v404_v46 = vpop.f32.mrf.mxu0 }
 0x4c9   : > { %332 = vst.msk [vmem:[%s331_s27] sm:$0x7] %vm113_vm10, %v329_v45  ;;  %122 = sbr.rel (!%p120_p1) target bundleno = 597 (0x255), region = 68 }
 0x4ca   : > { %v321_v47 = vpop.f32.mrf.mxu1 }
 0x4cb   : > { %328 = vst.msk [vmem:[%s326_s24 + $0x4] sm:$0x7] %vm113_vm10, %v321_v47  ;;  %v330_v48 = vsub.f32 %v321_v47, %v731_v24 }
 0x4cc   : > { %v409_v49 = vpop.f32.mrf.mxu1 }
 0x4cd   : > { %333 = vst.msk [vmem:[%s331_s27 + $0x4] sm:$0x7] %vm113_vm10, %v330_v48 }

</bundles_post_ra>
